<compile_context>
chip_gen: v7x
topology: tpu7x:2x2x1
jax: 0.10.0
libtpu: 0.0.40
codegen_flags: <defaults>
</compile_context>

<pallas_src>
import functools

import jax
import jax.numpy as jnp
from jax import lax
from jax.experimental import pallas as pl
from jax.experimental.pallas import tpu as pltpu

_LANES = 128
_SUBLANES = 8
_ROW_ALIGN = 32                        # covers int8 (32,128) native tiling; ok for wider dtypes
_CHUNK_ROWS = 512                      # fold granularity: bounds widened intermediates (~256 KiB)
_TILE_BYTES_PER_INPUT = 2 * 1024 * 1024  # per input, per pipeline buffer
_NUM_CORES = 2                         # shard across 2 TCs on v7x; harmless elsewhere
_VMEM_LIMIT_BYTES = 32 * 1024 * 1024


def _round_up(x, m):
    return (x + m - 1) // m * m


def _round_down(x, m):
    return (x // m) * m


def _sensitivity_kernel(yt_ref, yp_ref, tp_ref, pos_ref, *,
                        rows, tile_rows, chunk_rows, n_chunks,
                        tiles_per_core, binary_fast):
    step = pl.program_id(1)

    @pl.when(step == 0)
    def _init():
        tp_ref[...] = jnp.zeros_like(tp_ref)
        pos_ref[...] = jnp.zeros_like(pos_ref)

    # Logical tile this step covers (index_map clamps the DMA, we mask here).
    logical_tile = pl.program_id(0) * tiles_per_core + step
    # Rows of this tile holding real data; <= 0 for clamped duplicate tiles.
    valid_rows = rows - logical_tile * tile_rows

    def chunk_counts(yt2, yp2, m2):
        if binary_fast:
            # Labels are {0,1} int8: positives are the labels themselves and
            # TP is a bitwise AND — no compares, no bool->int selects.
            pos2 = yt2
            tp2 = yt2 & yp2
            if m2 is not None:
                pos2 = jnp.where(m2, pos2, 0)
                tp2 = jnp.where(m2, tp2, 0)
        else:
            pos2 = yt2 == 1
            tp2 = pos2 & (yp2 == 1)
            if m2 is not None:
                pos2 = pos2 & m2
                tp2 = tp2 & m2
        # Pure-VPU fold of the chunk into a vreg-shaped (8,128) int32 partial.
        tp_c = jnp.sum(tp2.astype(jnp.int32).reshape(-1, _SUBLANES, _LANES), axis=0)
        pos_c = jnp.sum(pos2.astype(jnp.int32).reshape(-1, _SUBLANES, _LANES), axis=0)
        return tp_c, pos_c

    def accumulate(masked):
        if masked:
            # Hoisted out of the chunk loop (broadcasts are not CSE'd).
            row2 = lax.broadcasted_iota(jnp.int32, (chunk_rows, _LANES), 0)

        def body(c, carry):
            tp_acc, pos_acc = carry
            r0 = c * chunk_rows
            if n_chunks > 1:
                r0 = pl.multiple_of(r0, chunk_rows)
            yt2 = yt_ref[pl.ds(r0, chunk_rows), :]
            yp2 = yp_ref[pl.ds(r0, chunk_rows), :]
            m2 = (row2 < valid_rows - r0) if masked else None
            tp_c, pos_c = chunk_counts(yt2, yp2, m2)
            return tp_acc + tp_c, pos_acc + pos_c

        init = (jnp.zeros((_SUBLANES, _LANES), jnp.int32),
                jnp.zeros((_SUBLANES, _LANES), jnp.int32))
        if n_chunks == 1:
            tp_p, pos_p = body(0, init)
        else:
            tp_p, pos_p = lax.fori_loop(0, n_chunks, body, init,
                                        unroll=min(n_chunks, 4))
        tp_ref[...] += tp_p
        pos_ref[...] += pos_p

    @pl.when(valid_rows >= tile_rows)
    def _full_tile():            # hot path: no masking work at all
        accumulate(masked=False)

    @pl.when(valid_rows < tile_rows)
    def _partial_tile():         # ragged tail / clamped duplicate tiles
        accumulate(masked=True)


def sensitivity(y_true, y_pred):
    """Sensitivity = TP / (TP + FN) for binary {0,1} label arrays."""
    yt = y_true.reshape(-1)
    yp = y_pred.reshape(-1)
    n = yt.shape[0]

    itemsize = max(jnp.dtype(yt.dtype).itemsize, jnp.dtype(yp.dtype).itemsize)
    binary_fast = (
        jnp.issubdtype(yt.dtype, jnp.integer) and jnp.dtype(yt.dtype).itemsize == 1
        and jnp.issubdtype(yp.dtype, jnp.integer) and jnp.dtype(yp.dtype).itemsize == 1
    )

    # Pad only when unavoidable: up to a whole 128-lane row (and, for tiny
    # inputs, one aligned row group). Zero labels contribute to neither count.
    # For n % 128 == 0 (the common case) there is NO wrapper-side copy; the
    # ragged tile tail is masked inside the kernel instead of padded out.
    target_n = max(_round_up(n, _LANES), _ROW_ALIGN * _LANES)
    pad = target_n - n
    if pad:
        yt = jnp.pad(yt, (0, pad))
        yp = jnp.pad(yp, (0, pad))
    rows = target_n // _LANES
    yt2d = yt.reshape(rows, _LANES)    # free: bitcast reshape of contiguous data
    yp2d = yp.reshape(rows, _LANES)

    # Tile sizing: largest tile within the per-buffer byte budget, never larger
    # than the array, aligned to the dtype row tiling and (when chunked) to the
    # fold chunk so in-kernel ref slices stay in bounds.
    budget_rows = _round_down(_TILE_BYTES_PER_INPUT // (_LANES * itemsize), _CHUNK_ROWS)
    tile_rows = min(budget_rows, _round_down(rows, _ROW_ALIGN))
    if tile_rows >= _CHUNK_ROWS:
        tile_rows = _round_down(tile_rows, _CHUNK_ROWS)
        chunk_rows = _CHUNK_ROWS
    else:
        chunk_rows = tile_rows
    n_chunks = tile_rows // chunk_rows

    tiles_total = pl.cdiv(rows, tile_rows)
    num_cores = min(_NUM_CORES, tiles_total)   # collapse the core axis for small inputs
    tiles_per_core = pl.cdiv(tiles_total, num_cores)

    def in_index_map(c, i):
        # Clamp so the DMA never targets a block past the array; the kernel
        # masks the duplicated / partial rows out of the counts.
        return (jnp.minimum(c * tiles_per_core + i, tiles_total - 1), 0)

    def out_index_map(c, i):
        return (c, 0, 0)

    kernel = functools.partial(
        _sensitivity_kernel,
        rows=rows, tile_rows=tile_rows, chunk_rows=chunk_rows,
        n_chunks=n_chunks, tiles_per_core=tiles_per_core,
        binary_fast=binary_fast)

    tp_out, pos_out = pl.pallas_call(
        kernel,
        out_shape=(
            jax.ShapeDtypeStruct((num_cores, _SUBLANES, _LANES), jnp.int32),
            jax.ShapeDtypeStruct((num_cores, _SUBLANES, _LANES), jnp.int32),
        ),
        grid_spec=pltpu.PrefetchScalarGridSpec(
            num_scalar_prefetch=0,
            grid=(num_cores, tiles_per_core),
            in_specs=[
                pl.BlockSpec((tile_rows, _LANES), in_index_map),
                pl.BlockSpec((tile_rows, _LANES), in_index_map),
            ],
            out_specs=[
                pl.BlockSpec((None, _SUBLANES, _LANES), out_index_map),
                pl.BlockSpec((None, _SUBLANES, _LANES), out_index_map),
            ],
        ),
        compiler_params=pltpu.CompilerParams(
            # Leading axis shards across TensorCores on v7x; ~neutral on
            # 1-TC v5e/v6e (and collapses to size 1 for small inputs).
            dimension_semantics=("parallel", "arbitrary"),
            vmem_limit_bytes=_VMEM_LIMIT_BYTES,
        ),
    )(yt2d, yp2d)

    # Combine per-core partials. sensitivity = tp / count(y_true == 1).
    # float32 sum: exact to ~16.7M positives, negligible relative error beyond;
    # avoids the int32-overflow concern for >2^31 positives.
    tp_tot = jnp.sum(tp_out.astype(jnp.float32))
    pos_tot = jnp.sum(pos_out.astype(jnp.float32))
    # NaN when there are no positives (tp + fn == 0), matching the reference.
    return tp_tot / pos_tot


if __name__ == "__main__":
    key = jax.random.PRNGKey(0)
    k1, k2 = jax.random.split(key)
    N = 4096
    y_true = jax.random.bernoulli(k1, 0.5, (N,)).astype(jnp.int8)
    y_pred = jax.random.bernoulli(k2, 0.5, (N,)).astype(jnp.int8)

    sens = sensitivity(y_true, y_pred)
    jax.block_until_ready(sens)

    # Reference check in plain JAX.
    tp = jnp.sum((y_true == 1) & (y_pred == 1)).astype(jnp.float32)
    fn = jnp.sum((y_true == 1) & (y_pred == 0)).astype(jnp.float32)
    ref = tp / (tp + fn)
    assert jnp.allclose(sens, ref, atol=1e-6), (sens, ref)

    print("KERNEL_OK")
</pallas_src>

<mosaic_0001>
module attributes {stable_mosaic.version = 11 : i64} {
  func.func @_sensitivity_kernel(%arg0: i32, %arg1: i32, %arg2: memref<32x128xi8, #tpu.memory_space<vmem>>, %arg3: memref<32x128xi8, #tpu.memory_space<vmem>>, %arg4: memref<1x8x128xi32, #tpu.memory_space<vmem>>, %arg5: memref<1x8x128xi32, #tpu.memory_space<vmem>>) attributes {dimension_semantics = [#tpu.dimension_semantics<parallel>, #tpu.dimension_semantics<arbitrary>], iteration_bounds = array<i64: 1, 1>, scalar_prefetch = 0 : i64, scratch_operands = 0 : i64, tpu.core_type = #tpu.core_type<tc>, window_params = [{transform_indices = @transform_0, window_bounds = array<i64: 32, 128>}, {transform_indices = @transform_1, window_bounds = array<i64: 32, 128>}, {transform_indices = @transform_2, window_bounds = array<i64: 1, 8, 128>}, {transform_indices = @transform_3, window_bounds = array<i64: 1, 8, 128>}]} {
    %c0_i32 = arith.constant 0 : i32
    %0 = arith.cmpi eq, %arg1, %c0_i32 : i32
    %1 = arith.extui %0 : i1 to i32
    %c0_i32_0 = arith.constant 0 : i32
    %2 = arith.cmpi ne, %1, %c0_i32_0 : i32
    scf.if %2 {
      %c0_i32_6 = arith.constant 0 : i32
      %13 = vector.broadcast %c0_i32_6 : i32 to vector<8x128xi32>
      %c0 = arith.constant 0 : index
      %c0_7 = arith.constant 0 : index
      %c0_8 = arith.constant 0 : index
      %14 = vector.load %arg4[%c0, %c0_7, %c0_8] : memref<1x8x128xi32, #tpu.memory_space<vmem>>, vector<1x8x128xi32>
      %15 = vector.shape_cast %14 : vector<1x8x128xi32> to vector<8x128xi32>
      %16 = vector.shape_cast %13 : vector<8x128xi32> to vector<1x8x128xi32>
      tpu.vector_store %arg4[%c0, %c0_7, %c0_8], %16 {strides = array<i32>} : memref<1x8x128xi32, #tpu.memory_space<vmem>>, vector<1x8x128xi32>,
      %c0_i32_9 = arith.constant 0 : i32
      %17 = vector.broadcast %c0_i32_9 : i32 to vector<8x128xi32>
      %c0_10 = arith.constant 0 : index
      %c0_11 = arith.constant 0 : index
      %c0_12 = arith.constant 0 : index
      %18 = vector.load %arg5[%c0_10, %c0_11, %c0_12] : memref<1x8x128xi32, #tpu.memory_space<vmem>>, vector<1x8x128xi32>
      %19 = vector.shape_cast %18 : vector<1x8x128xi32> to vector<8x128xi32>
      %20 = vector.shape_cast %17 : vector<8x128xi32> to vector<1x8x128xi32>
      tpu.vector_store %arg5[%c0_10, %c0_11, %c0_12], %20 {strides = array<i32>} : memref<1x8x128xi32, #tpu.memory_space<vmem>>, vector<1x8x128xi32>,
    } else {
    }
    %c1_i32 = arith.constant 1 : i32
    %3 = arith.muli %arg0, %c1_i32 : i32
    %4 = arith.addi %3, %arg1 : i32
    %c32_i32 = arith.constant 32 : i32
    %5 = arith.muli %4, %c32_i32 : i32
    %c32_i32_1 = arith.constant 32 : i32
    %6 = arith.subi %c32_i32_1, %5 : i32
    %c32_i32_2 = arith.constant 32 : i32
    %7 = arith.cmpi sge, %6, %c32_i32_2 : i32
    %8 = arith.extui %7 : i1 to i32
    %c0_i32_3 = arith.constant 0 : i32
    %9 = arith.cmpi ne, %8, %c0_i32_3 : i32
    scf.if %9 {
      %c0_i32_6 = arith.constant 0 : i32
      %13 = vector.broadcast %c0_i32_6 : i32 to vector<8x128xi32>
      %c0_i32_7 = arith.constant 0 : i32
      %14 = vector.broadcast %c0_i32_7 : i32 to vector<8x128xi32>
      %c0 = arith.constant 0 : index
      %c0_8 = arith.constant 0 : index
      %15 = vector.load %arg2[%c0, %c0_8] : memref<32x128xi8, #tpu.memory_space<vmem>>, vector<32x128xi8>
      %c0_9 = arith.constant 0 : index
      %c0_10 = arith.constant 0 : index
      %16 = vector.load %arg3[%c0_9, %c0_10] : memref<32x128xi8, #tpu.memory_space<vmem>>, vector<32x128xi8>
      %17 = arith.andi %15, %16 : vector<32x128xi8>
      %18 = arith.extsi %17 : vector<32x128xi8> to vector<32x128xi32>
      %19 = vector.shape_cast %18 : vector<32x128xi32> to vector<4x8x128xi32>
      %cst = arith.constant dense<0> : vector<8x128xi32>
      %20 = vector.multi_reduction <add>, %19, %cst [0] : vector<4x8x128xi32> to vector<8x128xi32>
      %21 = arith.extsi %15 : vector<32x128xi8> to vector<32x128xi32>
      %22 = vector.shape_cast %21 : vector<32x128xi32> to vector<4x8x128xi32>
      %cst_11 = arith.constant dense<0> : vector<8x128xi32>
      %23 = vector.multi_reduction <add>, %22, %cst_11 [0] : vector<4x8x128xi32> to vector<8x128xi32>
      %24 = arith.addi %13, %20 : vector<8x128xi32>
      %25 = arith.addi %14, %23 : vector<8x128xi32>
      %c0_12 = arith.constant 0 : index
      %c0_13 = arith.constant 0 : index
      %c0_14 = arith.constant 0 : index
      %26 = vector.load %arg4[%c0_12, %c0_13, %c0_14] : memref<1x8x128xi32, #tpu.memory_space<vmem>>, vector<1x8x128xi32>
      %27 = vector.shape_cast %26 : vector<1x8x128xi32> to vector<8x128xi32>
      %28 = arith.addi %27, %24 : vector<8x128xi32>
      %c0_15 = arith.constant 0 : index
      %c0_16 = arith.constant 0 : index
      %c0_17 = arith.constant 0 : index
      %29 = vector.load %arg4[%c0_15, %c0_16, %c0_17] : memref<1x8x128xi32, #tpu.memory_space<vmem>>, vector<1x8x128xi32>
      %30 = vector.shape_cast %29 : vector<1x8x128xi32> to vector<8x128xi32>
      %31 = vector.shape_cast %28 : vector<8x128xi32> to vector<1x8x128xi32>
      tpu.vector_store %arg4[%c0_15, %c0_16, %c0_17], %31 {strides = array<i32>} : memref<1x8x128xi32, #tpu.memory_space<vmem>>, vector<1x8x128xi32>,
      %c0_18 = arith.constant 0 : index
      %c0_19 = arith.constant 0 : index
      %c0_20 = arith.constant 0 : index
      %32 = vector.load %arg5[%c0_18, %c0_19, %c0_20] : memref<1x8x128xi32, #tpu.memory_space<vmem>>, vector<1x8x128xi32>
      %33 = vector.shape_cast %32 : vector<1x8x128xi32> to vector<8x128xi32>
      %34 = arith.addi %33, %25 : vector<8x128xi32>
      %c0_21 = arith.constant 0 : index
      %c0_22 = arith.constant 0 : index
      %c0_23 = arith.constant 0 : index
      %35 = vector.load %arg5[%c0_21, %c0_22, %c0_23] : memref<1x8x128xi32, #tpu.memory_space<vmem>>, vector<1x8x128xi32>
      %36 = vector.shape_cast %35 : vector<1x8x128xi32> to vector<8x128xi32>
      %37 = vector.shape_cast %34 : vector<8x128xi32> to vector<1x8x128xi32>
      tpu.vector_store %arg5[%c0_21, %c0_22, %c0_23], %37 {strides = array<i32>} : memref<1x8x128xi32, #tpu.memory_space<vmem>>, vector<1x8x128xi32>,
    } else {
    }
    %c32_i32_4 = arith.constant 32 : i32
    %10 = arith.cmpi slt, %6, %c32_i32_4 : i32
    %11 = arith.extui %10 : i1 to i32
    %c0_i32_5 = arith.constant 0 : i32
    %12 = arith.cmpi ne, %11, %c0_i32_5 : i32
    scf.if %12 {
      %13 = tpu.iota {dimensions = array<i32: 0>} : vector<32x128xi32>
      %c0_i32_6 = arith.constant 0 : i32
      %14 = vector.broadcast %c0_i32_6 : i32 to vector<8x128xi32>
      %c0_i32_7 = arith.constant 0 : i32
      %15 = vector.broadcast %c0_i32_7 : i32 to vector<8x128xi32>
      %c0 = arith.constant 0 : index
      %c0_8 = arith.constant 0 : index
      %16 = vector.load %arg2[%c0, %c0_8] : memref<32x128xi8, #tpu.memory_space<vmem>>, vector<32x128xi8>
      %c0_9 = arith.constant 0 : index
      %c0_10 = arith.constant 0 : index
      %17 = vector.load %arg3[%c0_9, %c0_10] : memref<32x128xi8, #tpu.memory_space<vmem>>, vector<32x128xi8>
      %c0_i32_11 = arith.constant 0 : i32
      %18 = arith.subi %6, %c0_i32_11 : i32
      %19 = vector.broadcast %18 : i32 to vector<32x128xi32>
      %20 = arith.cmpi slt, %13, %19 : vector<32x128xi32>
      %21 = arith.andi %16, %17 : vector<32x128xi8>
      %c0_i32_12 = arith.constant 0 : i32
      %22 = arith.trunci %c0_i32_12 : i32 to i8
      %23 = vector.broadcast %22 : i8 to vector<32x128xi8>
      %24 = arith.select %20, %16, %23 : vector<32x128xi1>, vector<32x128xi8>
      %c0_i32_13 = arith.constant 0 : i32
      %25 = arith.trunci %c0_i32_13 : i32 to i8
      %26 = vector.broadcast %25 : i8 to vector<32x128xi8>
      %27 = arith.select %20, %21, %26 : vector<32x128xi1>, vector<32x128xi8>
      %28 = arith.extsi %27 : vector<32x128xi8> to vector<32x128xi32>
      %29 = vector.shape_cast %28 : vector<32x128xi32> to vector<4x8x128xi32>
      %cst = arith.constant dense<0> : vector<8x128xi32>
      %30 = vector.multi_reduction <add>, %29, %cst [0] : vector<4x8x128xi32> to vector<8x128xi32>
      %31 = arith.extsi %24 : vector<32x128xi8> to vector<32x128xi32>
      %32 = vector.shape_cast %31 : vector<32x128xi32> to vector<4x8x128xi32>
      %cst_14 = arith.constant dense<0> : vector<8x128xi32>
      %33 = vector.multi_reduction <add>, %32, %cst_14 [0] : vector<4x8x128xi32> to vector<8x128xi32>
      %34 = arith.addi %14, %30 : vector<8x128xi32>
      %35 = arith.addi %15, %33 : vector<8x128xi32>
      %c0_15 = arith.constant 0 : index
      %c0_16 = arith.constant 0 : index
      %c0_17 = arith.constant 0 : index
      %36 = vector.load %arg4[%c0_15, %c0_16, %c0_17] : memref<1x8x128xi32, #tpu.memory_space<vmem>>, vector<1x8x128xi32>
      %37 = vector.shape_cast %36 : vector<1x8x128xi32> to vector<8x128xi32>
      %38 = arith.addi %37, %34 : vector<8x128xi32>
      %c0_18 = arith.constant 0 : index
      %c0_19 = arith.constant 0 : index
      %c0_20 = arith.constant 0 : index
      %39 = vector.load %arg4[%c0_18, %c0_19, %c0_20] : memref<1x8x128xi32, #tpu.memory_space<vmem>>, vector<1x8x128xi32>
      %40 = vector.shape_cast %39 : vector<1x8x128xi32> to vector<8x128xi32>
      %41 = vector.shape_cast %38 : vector<8x128xi32> to vector<1x8x128xi32>
      tpu.vector_store %arg4[%c0_18, %c0_19, %c0_20], %41 {strides = array<i32>} : memref<1x8x128xi32, #tpu.memory_space<vmem>>, vector<1x8x128xi32>,
      %c0_21 = arith.constant 0 : index
      %c0_22 = arith.constant 0 : index
      %c0_23 = arith.constant 0 : index
      %42 = vector.load %arg5[%c0_21, %c0_22, %c0_23] : memref<1x8x128xi32, #tpu.memory_space<vmem>>, vector<1x8x128xi32>
      %43 = vector.shape_cast %42 : vector<1x8x128xi32> to vector<8x128xi32>
      %44 = arith.addi %43, %35 : vector<8x128xi32>
      %c0_24 = arith.constant 0 : index
      %c0_25 = arith.constant 0 : index
      %c0_26 = arith.constant 0 : index
      %45 = vector.load %arg5[%c0_24, %c0_25, %c0_26] : memref<1x8x128xi32, #tpu.memory_space<vmem>>, vector<1x8x128xi32>
      %46 = vector.shape_cast %45 : vector<1x8x128xi32> to vector<8x128xi32>
      %47 = vector.shape_cast %44 : vector<8x128xi32> to vector<1x8x128xi32>
      tpu.vector_store %arg5[%c0_24, %c0_25, %c0_26], %47 {strides = array<i32>} : memref<1x8x128xi32, #tpu.memory_space<vmem>>, vector<1x8x128xi32>,
    } else {
    }
    return
  }
  func.func @transform_0(%arg0: i32, %arg1: i32) -> (i32, i32) {
    %c1_i32 = arith.constant 1 : i32
    %0 = arith.muli %arg0, %c1_i32 : i32
    %1 = arith.addi %0, %arg1 : i32
    %c0_i32 = arith.constant 0 : i32
    %2 = arith.minsi %1, %c0_i32 : i32
    %c0_i32_0 = arith.constant 0 : i32
    %c0_i32_1 = arith.constant 0 : i32
    return %2, %c0_i32_0 : i32, i32
  }
  func.func @transform_1(%arg0: i32, %arg1: i32) -> (i32, i32) {
    %c1_i32 = arith.constant 1 : i32
    %0 = arith.muli %arg0, %c1_i32 : i32
    %1 = arith.addi %0, %arg1 : i32
    %c0_i32 = arith.constant 0 : i32
    %2 = arith.minsi %1, %c0_i32 : i32
    %c0_i32_0 = arith.constant 0 : i32
    %c0_i32_1 = arith.constant 0 : i32
    return %2, %c0_i32_0 : i32, i32
  }
  func.func @transform_2(%arg0: i32, %arg1: i32) -> (i32, i32, i32) {
    %c0_i32 = arith.constant 0 : i32
    %c0_i32_0 = arith.constant 0 : i32
    %c0_i32_1 = arith.constant 0 : i32
    return %arg0, %c0_i32, %c0_i32_0 : i32, i32, i32
  }
  func.func @transform_3(%arg0: i32, %arg1: i32) -> (i32, i32, i32) {
    %c0_i32 = arith.constant 0 : i32
    %c0_i32_0 = arith.constant 0 : i32
    %c0_i32_1 = arith.constant 0 : i32
    return %arg0, %c0_i32, %c0_i32_0 : i32, i32, i32
  }
}

</mosaic_0001>

<bundles_post_ra>
// kernel: tpu_custom_call.1
= control target key start
LH: loop header
LB: loop body
LE: loop exit
PB: predicated region body
PF: predicated region fallthrough
CT: control target
= control target key end

     0   :  { %9 = vsyncpa [#allocation3], 0  ;;  %s359_s0 = inlined_call_operand.hbm [shape: s8[32,128], index: 0, kind: input, shape index: {}]   ;;  %s360_s1 = inlined_call_operand.hbm [shape: s8[32,128], index: 1, kind: input, shape index: {}]   ;;  %s361_s2 = inlined_call_operand.hbm [shape: s32[1,8,128], index: 2, kind: output, shape index: {0}]   ;;  %s362_s3 = inlined_call_operand.hbm [shape: s32[1,8,128], index: 3, kind: output, shape index: {1}]  }
   0x1   :  { %10 = vsyncpa [#allocation6], 0 }
   0x2   :  { %11 = vsyncpa [#allocation4], 0 }
   0x3   :  { %12 = vsyncpa [#allocation9], 0  ;;  %s287_s12 = smov [#allocation2]   ;;  %s288_s14 = smov [#allocation5]  }
   0x4   :  { %s24_s13 = sshll.u32 %s287_s12, 4  ;;  %s39_s15 = sshll.u32 %s288_s14, 4  ;;  %s25_s13 = int_to_ptr.vmem [resolvable:$true] %s24_s13  ;;  %s40_s15 = int_to_ptr.vmem [resolvable:$true] %s39_s15 }
   0x5   :  { %s191_s18 = scalar_lea.hbm %s359_s0, 128 }
   0x6   :  { %p192_p0 = scmp.ne.s32.totalorder %s359_s0, %s191_s18  ;;  %p195_p1 = scmp.lt.u32.totalorder %s191_s18, %s359_s0 }
   0x8   :  { %p197_p2 = pnand %p195_p1, %p192_p0 }
   0xa   :  { %200 = shalt.err (!%p197_p2)
}
   0xb   :  { %s201_s23 = scalar_lea.vmem %s25_s13, 128  ;;  %p206_p4 = scmp.lt.s32.totalorder %s25_s13, %s25_s13 }
   0xc   :  { %p202_p3 = scmp.ne.s32.totalorder %s25_s13, %s201_s23  ;;  %p207_p5 = scmp.lt.s32.totalorder %s201_s23, %s201_s23 }
   0xe   :  { %p208_p6 = por %p207_p5, %p206_p4 }
  0x10   :  { %p209_p7 = pnand %p208_p6, %p202_p3 }
  0x12   :  { %212 = shalt.err (!%p209_p7)
}
  0x13   :  { %27 = dma.hbm_to_vmem [thread:$0]  %s359_s0, 128, %s25_s13, [#allocation3]  }
  0x14   :  { %s213_s28 = scalar_lea.hbm %s360_s1, 128 }
  0x15   :  { %p214_p8 = scmp.ne.s32.totalorder %s360_s1, %s213_s28  ;;  %p217_p9 = scmp.lt.u32.totalorder %s213_s28, %s360_s1 }
  0x17   :  { %p219_p10 = pnand %p217_p9, %p214_p8 }
  0x19   :  { %222 = shalt.err (!%p219_p10)
}
  0x1a   :  { %s223_s6 = scalar_lea.vmem %s40_s15, 128  ;;  %p228_p12 = scmp.lt.s32.totalorder %s40_s15, %s40_s15 }
  0x1b   :  { %p224_p11 = scmp.ne.s32.totalorder %s40_s15, %s223_s6  ;;  %p229_p13 = scmp.lt.s32.totalorder %s223_s6, %s223_s6 }
  0x1d   :  { %p230_p0 = por %p229_p13, %p228_p12 }
  0x1f   :  { %p231_p1 = pnand %p230_p0, %p224_p11 }
  0x21   :  { %234 = shalt.err (!%p231_p1)
}
  0x22   :  { %42 = dma.hbm_to_vmem [thread:$0]  %s360_s1, 128, %s40_s15, [#allocation6]  }
  0x23   :  { %279 = dma.done.wait [#allocation3], 128  }
  0x24   :  { %280 = vsyncadd [#allocation3], 4294967168 }
  0x25   :  { %281 = dma.done.wait [#allocation6], 128  }
  0x26   :  { %282 = vsyncadd [#allocation6], 4294967168  ;;  %v70_v0 = vld [vmem:[#allocation2] sm:$0xff]  ;;  %v71_v1 = vld [vmem:[#allocation5] sm:$0xff]  ;;  %s289_s1 = smov [#allocation8]   ;;  %s290_s9 = smov [#allocation7]  }
  0x27   :  { %v72_v2 = vand.u32 %v71_v1, %v70_v0  ;;  %v80_v3 = vunpack.c.0.s8 %v70_v0  ;;  %v81_v4 = vunpack.c.1.s8 %v70_v0  ;;  %v82_v5 = vunpack.c.2.s8 %v70_v0  ;;  %s168_s8 = sshll.u32 %s289_s1, 4  ;;  %s158_s10 = sshll.u32 %s290_s9, 4  ;;  %s169_s8 = int_to_ptr.vmem [resolvable:$true] %s168_s8  ;;  %s159_s10 = int_to_ptr.vmem [resolvable:$true] %s158_s10 }
  0x28   :  { %v83_v6 = vunpack.c.3.s8 %v70_v0  ;;  %s235_s11 = scalar_lea.vmem %s169_s8, 128  ;;  %p240_p3 = scmp.lt.s32.totalorder %s169_s8, %s169_s8 }
  0x29   :  { %v73_v7 = vunpack.c.0.s8 %v72_v2  ;;  %v74_v8 = vunpack.c.1.s8 %v72_v2  ;;  %v75_v9 = vunpack.c.2.s8 %v72_v2  ;;  %v76_v10 = vunpack.c.3.s8 %v72_v2  ;;  %p236_p2 = scmp.ne.s32.totalorder %s169_s8, %s235_s11  ;;  %p241_p4 = scmp.lt.s32.totalorder %s235_s11, %s235_s11 }
  0x2a   :  { %v84_v11 = vadd.s32 %v81_v4, %v80_v3  ;;  %v85_v12 = vadd.s32 %v83_v6, %v82_v5 }
  0x2b   :  { %v77_v13 = vadd.s32 %v74_v8, %v73_v7  ;;  %v78_v14 = vadd.s32 %v76_v10, %v75_v9  ;;  %p242_p5 = por %p241_p4, %p240_p3 }
  0x2c   :  { %v86_v15 = vadd.s32 %v85_v12, %v84_v11 }
  0x2d   :  { %v79_v16 = vadd.s32 %v78_v14, %v77_v13  ;;  %p243_p6 = pnand %p242_p5, %p236_p2 }
  0x2e   :  { %92 = vst [vmem:[#allocation8] sm:$0xff] %v86_v15 }
  0x2f   :  { %89 = vst [vmem:[#allocation7] sm:$0xff] %v79_v16 }
  0x30   :  { %246 = shalt.err (!%p243_p6)
}
  0x31   :  { %s247_s14 = scalar_lea.hbm %s362_s3, 128 }
  0x32   :  { %p248_p7 = scmp.ne.s32.totalorder %s362_s3, %s247_s14  ;;  %p251_p8 = scmp.lt.u32.totalorder %s247_s14, %s362_s3 }
  0x34   :  { %p253_p9 = pnand %p251_p8, %p248_p7 }
  0x36   :  { %256 = shalt.err (!%p253_p9)
}
  0x37   :  { %171 = dma.vmem_to_hbm [thread:$0]  %s169_s8, 128, %s362_s3, [#allocation9]  }
  0x38   :  { %s257_s21 = scalar_lea.vmem %s159_s10, 128  ;;  %p262_p11 = scmp.lt.s32.totalorder %s159_s10, %s159_s10 }
  0x39   :  { %p258_p10 = scmp.ne.s32.totalorder %s159_s10, %s257_s21  ;;  %p263_p12 = scmp.lt.s32.totalorder %s257_s21, %s257_s21 }
  0x3b   :  { %p264_p13 = por %p263_p12, %p262_p11 }
  0x3d   :  { %p265_p0 = pnand %p264_p13, %p258_p10 }
  0x3f   :  { %268 = shalt.err (!%p265_p0)
}
  0x40   :  { %s269_s24 = scalar_lea.hbm %s361_s2, 128 }
  0x41   :  { %p270_p1 = scmp.ne.s32.totalorder %s361_s2, %s269_s24  ;;  %p273_p2 = scmp.lt.u32.totalorder %s269_s24, %s361_s2 }
  0x43   :  { %p275_p3 = pnand %p273_p2, %p270_p1 }
  0x45   :  { %278 = shalt.err (!%p275_p3)
}
  0x46   :  { %161 = dma.vmem_to_hbm [thread:$0]  %s159_s10, 128, %s361_s2, [#allocation4]  }
  0x47   :  { %283 = dma.done.wait [#allocation4], 128  }
  0x48   :  { %284 = vsyncadd [#allocation4], 4294967168 }
  0x49   :  { %285 = dma.done.wait [#allocation9], 128  }
  0x4a   :  { %286 = vsyncadd [#allocation9], 4294967168 }
  0x4b   :  { %178 = vsyncpa [#allocation3], 1 }
  0x4c   :  { %179 = vsyncpa [#allocation6], 1 }
  0x4d   :  { %180 = vsyncpa [#allocation4], 1 }
  0x4e   :  { %181 = vsyncpa [#allocation9], 1 }

</bundles_post_ra>
